<compile_context>
chip_gen: v7x
topology: tpu7x:2x2x1
jax: 0.10.0
libtpu: 0.0.40
codegen_flags: <defaults>
</compile_context>

<pallas_src>
import functools

import jax
import jax.numpy as jnp
from jax.experimental import pallas as pl
from jax.experimental.pallas import tpu as pltpu


def _squareplus_kernel(x_ref, o_ref):
    x = x_ref[...]
    # compute in f32 (sqrt), cast back to the output dtype
    xf = x.astype(jnp.float32)
    y = (xf + jnp.sqrt(xf * xf + 4.0)) * 0.5
    o_ref[...] = y.astype(o_ref.dtype)


@functools.lru_cache(maxsize=1)
def _tpu_config():
    """Return (num_tensorcores, target_block_bytes), generation-aware with a safe fallback."""
    num_tc = 1
    block_bytes = 4 * 1024 * 1024  # conservative default, safe on every generation
    try:
        info = pltpu.get_tpu_info()
        vmem = int(getattr(info, "vmem_capacity_bytes", 128 * 1024 * 1024))
        if vmem <= 64 * 1024 * 1024:
            # v7x-class: 64 MiB VMEM per TC, 2 TensorCores per chip.
            num_tc = 2
            block_bytes = 4 * 1024 * 1024   # 4x block (dbl-buffered in+out) = 16 MiB
        else:
            # v5e / v6e: 128 MiB VMEM, single TensorCore.
            num_tc = 1
            block_bytes = 8 * 1024 * 1024   # 4x block = 32 MiB
    except Exception:
        pass
    return num_tc, block_bytes


def squareplus(x, *, target_block_bytes=None):
    """Elementwise SquarePlus. Accepts any shape; tiles a lane-dense 2D view."""
    orig_shape = x.shape
    dtype = x.dtype
    n = x.size
    if n == 0:
        return x

    num_tc, default_block = _tpu_config()
    if target_block_bytes is None:
        target_block_bytes = default_block

    itemsize = jnp.dtype(dtype).itemsize
    # dtype-aware sublane packing: f32 -> 8, bf16 -> 16, int8/fp8 -> 32
    sublane = max(8, 32 // itemsize)

    # Widest lane dim that divides n (lane-dense 2D view, no padding needed).
    # Only 128-divisibility matters: the ragged last ROW block is masked by
    # Pallas, so no sublane*lane alignment of the flat array is required.
    lane = 128
    for cand in (1024, 512, 256, 128):
        if n % cand == 0:
            lane = cand
            break

    x_flat = x.reshape(-1)
    n_pad = ((n + lane - 1) // lane) * lane
    padded = n_pad != n
    if padded:  # only when n is not a multiple of 128
        x_flat = jnp.pad(x_flat, (0, n_pad - n))
    rows = n_pad // lane

    # Row tile sized to ~target_block_bytes, multiple of the sublane packing.
    tr = max(sublane, (target_block_bytes // (lane * itemsize)) // sublane * sublane)

    if rows <= tr:
        # Small array: single full-extent block (always a legal block shape).
        tr = rows
    elif num_tc >= 2:
        # Megacore (v7x): pick a block count that is a multiple of the TC count,
        # with roughly equal block sizes, so neither core idles on a ragged tail.
        nblocks = max(num_tc, pl.cdiv(rows, tr))
        nblocks = ((nblocks + num_tc - 1) // num_tc) * num_tc
        tr = ((pl.cdiv(rows, nblocks) + sublane - 1) // sublane) * sublane
        tr = min(tr, rows)
    # Single-TC chips (v5e/v6e): keep the full-size tile; splitting only adds
    # per-grid-step overhead.

    grid = (pl.cdiv(rows, tr),)  # partial last block is masked by Pallas

    out2d = pl.pallas_call(
        _squareplus_kernel,
        out_shape=jax.ShapeDtypeStruct((rows, lane), dtype),
        grid_spec=pltpu.PrefetchScalarGridSpec(
            num_scalar_prefetch=0,
            grid=grid,
            in_specs=[pl.BlockSpec((tr, lane), lambda i: (i, 0))],
            out_specs=pl.BlockSpec((tr, lane), lambda i: (i, 0)),
        ),
        compiler_params=pltpu.CompilerParams(
            dimension_semantics=("parallel",),
            vmem_limit_bytes=48 * 1024 * 1024,
        ),
        cost_estimate=pl.CostEstimate(
            flops=3 * n_pad,
            transcendentals=n_pad,
            bytes_accessed=2 * n_pad * itemsize,
        ),
    )(x_flat.reshape(rows, lane))

    out_flat = out2d.reshape(-1)
    if padded:
        out_flat = out_flat[:n]
    return out_flat.reshape(orig_shape)


if __name__ == "__main__":
    key = jax.random.PRNGKey(0)
    # small NCHW input consistent with a conv-style activation module
    x = jax.random.normal(key, (2, 4, 16, 16), dtype=jnp.float32) * 3.0

    y = squareplus(x)
    y = jax.block_until_ready(y)

    # reference in plain JAX (matches the PyTorch module exactly)
    y_ref = (x + jnp.sqrt(x * x + 4.0)) / 2.0
    assert y.shape == x.shape and y.dtype == x.dtype
    assert jnp.allclose(y, y_ref, atol=1e-5, rtol=1e-5), "mismatch vs reference"

    print("KERNEL_OK")
</pallas_src>

<mosaic_0001>
module attributes {stable_mosaic.version = 11 : i64} {
  func.func @_squareplus_kernel(%arg0: i32, %arg1: memref<2x1024xf32, #tpu.memory_space<vmem>>, %arg2: memref<2x1024xf32, #tpu.memory_space<vmem>>) attributes {dimension_semantics = [#tpu.dimension_semantics<parallel>], iteration_bounds = array<i64: 1>, scalar_prefetch = 0 : i64, scratch_operands = 0 : i64, tpu.core_type = #tpu.core_type<tc>, window_params = [{transform_indices = @transform_0, window_bounds = array<i64: 2, 1024>}, {transform_indices = @transform_1, window_bounds = array<i64: 2, 1024>}]} {
    %c0 = arith.constant 0 : index
    %c0_0 = arith.constant 0 : index
    %0 = vector.load %arg1[%c0, %c0_0] : memref<2x1024xf32, #tpu.memory_space<vmem>>, vector<2x1024xf32>
    %1 = arith.mulf %0, %0 : vector<2x1024xf32>
    %cst = arith.constant 4.000000e+00 : f32
    %2 = vector.broadcast %cst : f32 to vector<2x1024xf32>
    %3 = arith.addf %1, %2 : vector<2x1024xf32>
    %4 = math.sqrt %3 : vector<2x1024xf32>
    %5 = arith.addf %0, %4 : vector<2x1024xf32>
    %cst_1 = arith.constant 5.000000e-01 : f32
    %6 = vector.broadcast %cst_1 : f32 to vector<2x1024xf32>
    %7 = arith.mulf %5, %6 : vector<2x1024xf32>
    %c0_2 = arith.constant 0 : index
    %c0_3 = arith.constant 0 : index
    %8 = vector.load %arg2[%c0_2, %c0_3] : memref<2x1024xf32, #tpu.memory_space<vmem>>, vector<2x1024xf32>
    tpu.vector_store %arg2[%c0_2, %c0_3], %7 {strides = array<i32>} : memref<2x1024xf32, #tpu.memory_space<vmem>>, vector<2x1024xf32>,
    return
  }
  func.func @transform_0(%arg0: i32) -> (i32, i32) {
    %c0_i32 = arith.constant 0 : i32
    %c0_i32_0 = arith.constant 0 : i32
    return %arg0, %c0_i32 : i32, i32
  }
  func.func @transform_1(%arg0: i32) -> (i32, i32) {
    %c0_i32 = arith.constant 0 : i32
    %c0_i32_0 = arith.constant 0 : i32
    return %arg0, %c0_i32 : i32, i32
  }
}

</mosaic_0001>

<bundles_post_ra>
// kernel: tpu_custom_call.1
= control target key start
LH: loop header
LB: loop body
LE: loop exit
PB: predicated region body
PF: predicated region fallthrough
CT: control target
= control target key end

     0   :  { %6 = vsyncpa [#allocation3], 0  ;;  %s152_s0 = inlined_call_operand.hbm [shape: f32[2,1024], index: 0, kind: input, shape index: {}]   ;;  %s153_s1 = inlined_call_operand.hbm [shape: f32[2,1024], index: 1, kind: output, shape index: {}]  }
   0x1   :  { %7 = vsyncpa [#allocation4], 0  ;;  %s116_s6 = smov [#allocation2]   ;;  %s68_s10 = scalar_lea.hbm %s152_s0, 256 }
   0x2   :  { %s14_s7 = sshll.u32 %s116_s6, 4  ;;  %p69_p0 = scmp.ne.s32.totalorder %s152_s0, %s68_s10  ;;  %s15_s7 = int_to_ptr.vmem [resolvable:$true] %s14_s7 }
   0x3   :  { %p72_p1 = scmp.lt.u32.totalorder %s68_s10, %s152_s0 }
   0x5   :  { %p74_p2 = pnand %p72_p1, %p69_p0 }
   0x7   :  { %77 = shalt.err (!%p74_p2)
}
   0x8   :  { %s78_s15 = scalar_lea.vmem %s15_s7, 256  ;;  %p83_p4 = scmp.lt.s32.totalorder %s15_s7, %s15_s7 }
   0x9   :  { %p79_p3 = scmp.ne.s32.totalorder %s15_s7, %s78_s15  ;;  %p84_p5 = scmp.lt.s32.totalorder %s78_s15, %s78_s15 }
   0xb   :  { %p85_p6 = por %p84_p5, %p83_p4 }
   0xd   :  { %p86_p7 = pnand %p85_p6, %p79_p3 }
   0xf   :  { %89 = shalt.err (!%p86_p7)
}
  0x10   :  { %17 = dma.hbm_to_vmem [thread:$0]  %s152_s0, 256, %s15_s7, [#allocation3]  }
  0x11   :  { %112 = dma.done.wait [#allocation3], 256  }
  0x12   :  { %113 = vsyncadd [#allocation3], 4294967040  ;;  %v21_v0 = vld [vmem:[#allocation2] sm:$0xff]  ;;  %v22_v1 = vld [vmem:[#allocation2 + $0x8] sm:$0xff]  ;;  %s117_s0 = smov [#allocation5]  }
  0x13   :  { %v23_v2 = vmul.f32 %v21_v0, %v21_v0  ;;  %v24_v3 = vmul.f32 %v22_v1, %v22_v1  ;;  %s53_s18 = sshll.u32 %s117_s0, 4  ;;  %s54_s18 = int_to_ptr.vmem [resolvable:$true] %s53_s18 }
  0x14   :  { %s90_s19 = scalar_lea.vmem %s54_s18, 256  ;;  %p95_p9 = scmp.lt.s32.totalorder %s54_s18, %s54_s18 }
  0x15   :  { %v25_v4 = vadd.f32 4.0, %v23_v2  ;;  %v26_v5 = vadd.f32 4.0, %v24_v3  ;;  %p91_p8 = scmp.ne.s32.totalorder %s54_s18, %s90_s19  ;;  %p96_p10 = scmp.lt.s32.totalorder %s90_s19, %s90_s19 }
  0x17   :  { %64 = vrsqrt.f32 %v25_v4  ;;  %vm29_vm0 = vcmp.eq.f32.partialorder %v25_v4, inf  ;;  %v32_v7 = vand.u32 2147483648, %v25_v4  ;;  %vm31_vm1 = vcmp.eq.f32.partialorder %v25_v4, 0.0  ;;  %p97_p11 = por %p96_p10, %p95_p9 }
  0x18   :  { %66 = vrsqrt.f32 %v26_v5  ;;  %vm36_vm2 = vcmp.eq.f32.partialorder %v26_v5, inf  ;;  %v39_v10 = vand.u32 2147483648, %v26_v5  ;;  %vm38_vm3 = vcmp.eq.f32.partialorder %v26_v5, 0.0 }
  0x19   :  { %p98_p12 = pnand %p97_p11, %p91_p8 }
  0x21   :  { %v65_v6 = vpop.eup %64 }
  0x22   :  { %v67_v8 = vpop.eup %66  ;;  %v28_v9 = vmul.f32 %v65_v6, %v25_v4 }
  0x23   :  { %v35_v11 = vmul.f32 %v67_v8, %v26_v5 }
  0x24   :  { %v30_v12 = vsel %vm29_vm0, %v25_v4, %v28_v9 }
  0x25   :  { %v33_v13 = vsel %vm31_vm1, %v32_v7, %v30_v12  ;;  %v37_v14 = vsel %vm36_vm2, %v26_v5, %v35_v11 }
  0x26   :  { %v41_v15 = vadd.f32 %v33_v13, %v21_v0  ;;  %v40_v16 = vsel %vm38_vm3, %v39_v10, %v37_v14 }
  0x27   :  { %v42_v17 = vadd.f32 %v40_v16, %v22_v1 }
  0x28   :  { %v43_v18 = vmul.f32 0.5, %v41_v15 }
  0x29   :  { %v44_v19 = vmul.f32 0.5, %v42_v17 }
  0x2a   :  { %45 = vst [vmem:[#allocation5] sm:$0xff] %v43_v18 }
  0x2b   :  { %46 = vst [vmem:[#allocation5 + $0x8] sm:$0xff] %v44_v19 }
  0x2c   :  { %101 = shalt.err (!%p98_p12)
}
  0x2d   :  { %s102_s22 = scalar_lea.hbm %s153_s1, 256 }
  0x2e   :  { %p103_p13 = scmp.ne.s32.totalorder %s153_s1, %s102_s22  ;;  %p106_p0 = scmp.lt.u32.totalorder %s102_s22, %s153_s1 }
  0x30   :  { %p108_p1 = pnand %p106_p0, %p103_p13 }
  0x32   :  { %111 = shalt.err (!%p108_p1)
}
  0x33   :  { %56 = dma.vmem_to_hbm [thread:$0]  %s54_s18, 256, %s153_s1, [#allocation4]  }
  0x34   :  { %114 = dma.done.wait [#allocation4], 256  }
  0x35   :  { %115 = vsyncadd [#allocation4], 4294967040 }
  0x36   :  { %60 = vsyncpa [#allocation3], 1 }
  0x37   :  { %61 = vsyncpa [#allocation4], 1 }

</bundles_post_ra>
